<compile_context>
chip_gen: v7x
topology: tpu7x:2x2x1
jax: 0.10.0
libtpu: 0.0.40
codegen_flags: <defaults>
</compile_context>

<pallas_src>
import math

import jax
import jax.numpy as jnp
from jax.experimental import pallas as pl
from jax.experimental.pallas import tpu as pltpu


def ensemble_head_kernel(o1_ref, o2_ref, w1a_ref, w1b_ref, b1_ref,
                         w2_ref, b2_ref, y_ref):
    # o1_ref, o2_ref: [tile_b, f1] / [tile_b, f2] f32 activation tiles.
    # w1a_ref: [f1, hid], w1b_ref: [f2, hid], b1_ref: [1, hid]     (resident)
    # w2_ref : [hid, out_f], b2_ref: [1, out_f]                    (resident)
    # y_ref  : [tile_b, out_f]
    h = (jnp.dot(o1_ref[...], w1a_ref[...], preferred_element_type=jnp.float32)
         + jnp.dot(o2_ref[...], w1b_ref[...], preferred_element_type=jnp.float32)
         + b1_ref[...])                                   # fc1 (cat folded in)
    h = jnp.maximum(h, 0.0)                               # nn.ReLU (VPU)
    y_ref[...] = (jnp.dot(h, w2_ref[...], preferred_element_type=jnp.float32)
                  + b2_ref[...]).astype(y_ref.dtype)      # fc2


def ensemble_head(out1, out2, w1, b1, w2, b2, *, tile_b=1024):
    """out1, out2: [B, 10] sub-model logits.  w1: [15, 20], b1: [15],
    w2: [10, 15], b2: [10].  Returns [B, 10] f32 logits equal to
    fc2(relu(fc1(cat([out1, out2], 1)))).
    """
    B, f1 = out1.shape
    _, f2 = out2.shape
    hid, in_f = w1.shape                     # 15, 20
    out_f = w2.shape[0]                      # 10
    assert f1 + f2 == in_f and w2.shape[1] == hid

    # Batch tile: either the whole (possibly tiny) batch, or a multiple of 8.
    if B <= tile_b:
        tile_b = B
    else:
        tile_b = max(8, (tile_b // 8) * 8)
    n_tiles = pl.cdiv(B, tile_b)

    out1 = out1.astype(jnp.float32)
    out2 = out2.astype(jnp.float32)
    w1f = w1.astype(jnp.float32)
    # Fold torch.cat into fc1: split W1 by input half; pre-transpose so the
    # kernel does plain x @ w (no in-kernel transposes).  All tiny, one-off.
    w1a_t = w1f[:, :f1].T                                  # [f1, hid]
    w1b_t = w1f[:, f1:].T                                  # [f2, hid]
    w2_t = w2.astype(jnp.float32).T                        # [hid, out_f]
    b1r = b1.astype(jnp.float32).reshape(1, hid)           # [1, hid]
    b2r = b2.astype(jnp.float32).reshape(1, out_f)         # [1, out_f]

    flops = 2 * B * (in_f * hid + hid * out_f)
    bytes_accessed = (B * (f1 + f2) * 4 + B * out_f * 4
                      + (w1a_t.size + w1b_t.size + w2_t.size + hid + out_f) * 4)

    y = pl.pallas_call(
        ensemble_head_kernel,
        out_shape=jax.ShapeDtypeStruct((B, out_f), jnp.float32),
        grid=(n_tiles,),
        in_specs=[
            pl.BlockSpec((tile_b, f1), lambda i: (i, 0)),    # out1 tile (stream)
            pl.BlockSpec((tile_b, f2), lambda i: (i, 0)),    # out2 tile (stream)
            pl.BlockSpec((f1, hid), lambda i: (0, 0)),       # W1a^T   (resident)
            pl.BlockSpec((f2, hid), lambda i: (0, 0)),       # W1b^T   (resident)
            pl.BlockSpec((1, hid), lambda i: (0, 0)),        # b1      (resident)
            pl.BlockSpec((hid, out_f), lambda i: (0, 0)),    # W2^T    (resident)
            pl.BlockSpec((1, out_f), lambda i: (0, 0)),      # b2      (resident)
        ],
        out_specs=pl.BlockSpec((tile_b, out_f), lambda i: (i, 0)),
        compiler_params=pltpu.CompilerParams(
            dimension_semantics=("parallel",)),              # batch-independent
        cost_estimate=pl.CostEstimate(flops=flops, transcendentals=0,
                                      bytes_accessed=bytes_accessed),
    )(out1, out2, w1a_t, w1b_t, b1r, w2_t, b2r)

    return y


def _linear_init(key, out_f, in_f):
    # Deterministic nn.Linear-style init: U(-1/sqrt(in_f), 1/sqrt(in_f)).
    kw, kb = jax.random.split(key)
    bound = 1.0 / math.sqrt(in_f)
    w = jax.random.uniform(kw, (out_f, in_f), jnp.float32, -bound, bound)
    b = jax.random.uniform(kb, (out_f,), jnp.float32, -bound, bound)
    return w, b


def _reference(out1, out2, w1, b1, w2, b2):
    x = jnp.concatenate([out1, out2], axis=1)
    h = jnp.maximum(x @ w1.T + b1, 0.0)
    return h @ w2.T + b2


if __name__ == "__main__":
    key = jax.random.PRNGKey(0)
    k_o1, k_o2, k_fc1, k_fc2, k_big = jax.random.split(key, 5)

    # fc1: Linear(20, 15), fc2: Linear(15, 10)
    w1, b1 = _linear_init(k_fc1, 15, 20)
    w2, b2 = _linear_init(k_fc2, 10, 15)

    # Small case (batch=2): stand-ins for the two MNIST_GAT2 sub-model outputs.
    B = 2
    out1 = jax.random.normal(k_o1, (B, 10), jnp.float32)
    out2 = jax.random.normal(k_o2, (B, 10), jnp.float32)

    y = jax.block_until_ready(ensemble_head(out1, out2, w1, b1, w2, b2))
    ref = _reference(out1, out2, w1, b1, w2, b2)
    assert y.shape == (B, 10)
    assert jnp.allclose(y, ref, atol=1e-4, rtol=1e-4)

    # Multi-tile case with a ragged final block to exercise the batch grid.
    B2 = 1000
    ko1, ko2 = jax.random.split(k_big)
    out1b = jax.random.normal(ko1, (B2, 10), jnp.float32)
    out2b = jax.random.normal(ko2, (B2, 10), jnp.float32)
    y2 = jax.block_until_ready(
        ensemble_head(out1b, out2b, w1, b1, w2, b2, tile_b=256))
    ref2 = _reference(out1b, out2b, w1, b1, w2, b2)
    assert y2.shape == (B2, 10)
    assert jnp.allclose(y2, ref2, atol=1e-4, rtol=1e-4)

    print("KERNEL_OK")
</pallas_src>

<mosaic_0001>
module attributes {stable_mosaic.version = 11 : i64} {
  func.func @ensemble_head_kernel(%arg0: i32, %arg1: memref<2x10xf32, #tpu.memory_space<vmem>>, %arg2: memref<2x10xf32, #tpu.memory_space<vmem>>, %arg3: memref<10x15xf32, #tpu.memory_space<vmem>>, %arg4: memref<10x15xf32, #tpu.memory_space<vmem>>, %arg5: memref<1x15xf32, #tpu.memory_space<vmem>>, %arg6: memref<15x10xf32, #tpu.memory_space<vmem>>, %arg7: memref<1x10xf32, #tpu.memory_space<vmem>>, %arg8: memref<2x10xf32, #tpu.memory_space<vmem>>) attributes {dimension_semantics = [#tpu.dimension_semantics<parallel>], iteration_bounds = array<i64: 1>, scalar_prefetch = 0 : i64, scratch_operands = 0 : i64, tpu.core_type = #tpu.core_type<tc>, window_params = [{transform_indices = @transform_0, window_bounds = array<i64: 2, 10>}, {transform_indices = @transform_1, window_bounds = array<i64: 2, 10>}, {pipeline_mode = #tpu.pipeline_mode<synchronous>, transform_indices = @transform_2, window_bounds = array<i64: 10, 15>}, {pipeline_mode = #tpu.pipeline_mode<synchronous>, transform_indices = @transform_3, window_bounds = array<i64: 10, 15>}, {pipeline_mode = #tpu.pipeline_mode<synchronous>, transform_indices = @transform_4, window_bounds = array<i64: 1, 15>}, {pipeline_mode = #tpu.pipeline_mode<synchronous>, transform_indices = @transform_5, window_bounds = array<i64: 15, 10>}, {pipeline_mode = #tpu.pipeline_mode<synchronous>, transform_indices = @transform_6, window_bounds = array<i64: 1, 10>}, {transform_indices = @transform_7, window_bounds = array<i64: 2, 10>}]} {
    %c0 = arith.constant 0 : index
    %c0_0 = arith.constant 0 : index
    %0 = vector.load %arg1[%c0, %c0_0] : memref<2x10xf32, #tpu.memory_space<vmem>>, vector<2x10xf32>
    %c0_1 = arith.constant 0 : index
    %c0_2 = arith.constant 0 : index
    %1 = vector.load %arg3[%c0_1, %c0_2] : memref<10x15xf32, #tpu.memory_space<vmem>>, vector<10x15xf32>
    %cst = arith.constant dense<0.000000e+00> : vector<2x15xf32>
    %2 = tpu.matmul %0, %1, %cst {dimension_numbers = #tpu.dot_dimension_numbers<[1], [0], [0], [1], [0, 0, 1, 1], [], []>} : vector<2x10xf32>, vector<10x15xf32>, vector<2x15xf32> -> vector<2x15xf32>
    %c0_3 = arith.constant 0 : index
    %c0_4 = arith.constant 0 : index
    %3 = vector.load %arg2[%c0_3, %c0_4] : memref<2x10xf32, #tpu.memory_space<vmem>>, vector<2x10xf32>
    %c0_5 = arith.constant 0 : index
    %c0_6 = arith.constant 0 : index
    %4 = vector.load %arg4[%c0_5, %c0_6] : memref<10x15xf32, #tpu.memory_space<vmem>>, vector<10x15xf32>
    %cst_7 = arith.constant dense<0.000000e+00> : vector<2x15xf32>
    %5 = tpu.matmul %3, %4, %cst_7 {dimension_numbers = #tpu.dot_dimension_numbers<[1], [0], [0], [1], [0, 0, 1, 1], [], []>} : vector<2x10xf32>, vector<10x15xf32>, vector<2x15xf32> -> vector<2x15xf32>
    %6 = arith.addf %2, %5 : vector<2x15xf32>
    %c0_8 = arith.constant 0 : index
    %c0_9 = arith.constant 0 : index
    %7 = vector.load %arg5[%c0_8, %c0_9] : memref<1x15xf32, #tpu.memory_space<vmem>>, vector<1x15xf32>
    %8 = vector.broadcast %7 : vector<1x15xf32> to vector<2x15xf32>
    %9 = arith.addf %6, %8 : vector<2x15xf32>
    %cst_10 = arith.constant 0.000000e+00 : f32
    %10 = vector.broadcast %cst_10 : f32 to vector<2x15xf32>
    %11 = arith.maximumf %9, %10 : vector<2x15xf32>
    %c0_11 = arith.constant 0 : index
    %c0_12 = arith.constant 0 : index
    %12 = vector.load %arg6[%c0_11, %c0_12] : memref<15x10xf32, #tpu.memory_space<vmem>>, vector<15x10xf32>
    %cst_13 = arith.constant dense<0.000000e+00> : vector<2x10xf32>
    %13 = tpu.matmul %11, %12, %cst_13 {dimension_numbers = #tpu.dot_dimension_numbers<[1], [0], [0], [1], [0, 0, 1, 1], [], []>} : vector<2x15xf32>, vector<15x10xf32>, vector<2x10xf32> -> vector<2x10xf32>
    %c0_14 = arith.constant 0 : index
    %c0_15 = arith.constant 0 : index
    %14 = vector.load %arg7[%c0_14, %c0_15] : memref<1x10xf32, #tpu.memory_space<vmem>>, vector<1x10xf32>
    %15 = vector.broadcast %14 : vector<1x10xf32> to vector<2x10xf32>
    %16 = arith.addf %13, %15 : vector<2x10xf32>
    %c0_16 = arith.constant 0 : index
    %c0_17 = arith.constant 0 : index
    %17 = vector.load %arg8[%c0_16, %c0_17] : memref<2x10xf32, #tpu.memory_space<vmem>>, vector<2x10xf32>
    tpu.vector_store %arg8[%c0_16, %c0_17], %16 {strides = array<i32>} : memref<2x10xf32, #tpu.memory_space<vmem>>, vector<2x10xf32>,
    return
  }
  func.func @transform_0(%arg0: i32) -> (i32, i32) {
    %c0_i32 = arith.constant 0 : i32
    %c0_i32_0 = arith.constant 0 : i32
    return %arg0, %c0_i32 : i32, i32
  }
  func.func @transform_1(%arg0: i32) -> (i32, i32) {
    %c0_i32 = arith.constant 0 : i32
    %c0_i32_0 = arith.constant 0 : i32
    return %arg0, %c0_i32 : i32, i32
  }
  func.func @transform_2(%arg0: i32) -> (i32, i32) {
    %c0_i32 = arith.constant 0 : i32
    %c0_i32_0 = arith.constant 0 : i32
    %c0_i32_1 = arith.constant 0 : i32
    return %c0_i32, %c0_i32_0 : i32, i32
  }
  func.func @transform_3(%arg0: i32) -> (i32, i32) {
    %c0_i32 = arith.constant 0 : i32
    %c0_i32_0 = arith.constant 0 : i32
    %c0_i32_1 = arith.constant 0 : i32
    return %c0_i32, %c0_i32_0 : i32, i32
  }
  func.func @transform_4(%arg0: i32) -> (i32, i32) {
    %c0_i32 = arith.constant 0 : i32
    %c0_i32_0 = arith.constant 0 : i32
    %c0_i32_1 = arith.constant 0 : i32
    return %c0_i32, %c0_i32_0 : i32, i32
  }
  func.func @transform_5(%arg0: i32) -> (i32, i32) {
    %c0_i32 = arith.constant 0 : i32
    %c0_i32_0 = arith.constant 0 : i32
    %c0_i32_1 = arith.constant 0 : i32
    return %c0_i32, %c0_i32_0 : i32, i32
  }
  func.func @transform_6(%arg0: i32) -> (i32, i32) {
    %c0_i32 = arith.constant 0 : i32
    %c0_i32_0 = arith.constant 0 : i32
    %c0_i32_1 = arith.constant 0 : i32
    return %c0_i32, %c0_i32_0 : i32, i32
  }
  func.func @transform_7(%arg0: i32) -> (i32, i32) {
    %c0_i32 = arith.constant 0 : i32
    %c0_i32_0 = arith.constant 0 : i32
    return %arg0, %c0_i32 : i32, i32
  }
}

</mosaic_0001>

<bundles_post_ra>
// kernel: tpu_custom_call.1
= control target key start
LH: loop header
LB: loop body
LE: loop exit
PB: predicated region body
PF: predicated region fallthrough
CT: control target
= control target key end

     0   :  { %12 = vsyncpa [#allocation3], 0  ;;  %s666_s0 = inlined_call_operand.hbm [shape: f32[2,10], index: 0, kind: input, shape index: {}]   ;;  %s667_s1 = inlined_call_operand.vmem [shape: f32[2,10], index: 1, kind: input, shape index: {}]   ;;  %s668_s2 = inlined_call_operand.hbm [shape: f32[10,15], index: 2, kind: input, shape index: {}]   ;;  %s669_s3 = inlined_call_operand.hbm [shape: f32[10,15], index: 3, kind: input, shape index: {}]   ;;  %s670_s4 = inlined_call_operand.hbm [shape: f32[1,15], index: 4, kind: input, shape index: {}]   ;;  %s671_s5 = inlined_call_operand.vmem [shape: f32[15,10], index: 5, kind: input, shape index: {}]   ;;  %s672_s6 = inlined_call_operand.vmem [shape: f32[1,10], index: 6, kind: input, shape index: {}]   ;;  %s673_s7 = inlined_call_operand.hbm [shape: f32[2,10], index: 7, kind: output, shape index: {}]  }
   0x1   :  { %13 = vsyncpa [#allocation6], 0 }
   0x2   :  { %14 = vsyncpa [#allocation9], 0 }
   0x3   :  { %15 = vsyncpa [#allocation4], 0  ;;  %s532_s24 = smov [#allocation5]   ;;  %s414_s28 = scalar_lea.hbm %s668_s2, 256 }
   0x4   :  { %s33_s25 = sshll.u32 %s532_s24, 4  ;;  %p415_p0 = scmp.ne.s32.totalorder %s668_s2, %s414_s28  ;;  %s34_s25 = int_to_ptr.vmem [resolvable:$true] %s33_s25 }
   0x5   :  { %p418_p1 = scmp.lt.u32.totalorder %s414_s28, %s668_s2 }
   0x7   :  { %p420_p2 = pnand %p418_p1, %p415_p0 }
   0x9   :  { %423 = shalt.err (!%p420_p2)
}
   0xa   :  { %s424_s10 = scalar_lea.vmem %s34_s25, 256  ;;  %p429_p4 = scmp.lt.s32.totalorder %s34_s25, %s34_s25 }
   0xb   :  { %p425_p3 = scmp.ne.s32.totalorder %s34_s25, %s424_s10  ;;  %p430_p5 = scmp.lt.s32.totalorder %s424_s10, %s424_s10 }
   0xd   :  { %p431_p6 = por %p430_p5, %p429_p4 }
   0xf   :  { %p432_p7 = pnand %p431_p6, %p425_p3 }
  0x11   :  { %435 = shalt.err (!%p432_p7)
}
  0x12   :  { %s533_s11 = smov 128   ;;  %s534_s12 = smov 8  }
  0x13   :  { %39 = dma.hbm_to_vmem [thread:$0]  %s668_s2, 256, %s34_s25, [#allocation6], %s533_s11, %s533_s11, %s534_s12  }
  0x14   :  { %s535_s15 = smov [#allocation2]   ;;  %s536_s17 = smov [#allocation7]  }
  0x15   :  { %s22_s16 = sshll.u32 %s535_s15, 4  ;;  %s45_s18 = sshll.u32 %s536_s17, 4  ;;  %s23_s16 = int_to_ptr.vmem [resolvable:$true] %s22_s16  ;;  %s46_s18 = int_to_ptr.vmem [resolvable:$true] %s45_s18 }
  0x16   :  { %s436_s21 = scalar_lea.hbm %s666_s0, 32 }
  0x17   :  { %p437_p8 = scmp.ne.s32.totalorder %s666_s0, %s436_s21  ;;  %p440_p9 = scmp.lt.u32.totalorder %s436_s21, %s666_s0 }
  0x19   :  { %p442_p10 = pnand %p440_p9, %p437_p8 }
  0x1b   :  { %445 = shalt.err (!%p442_p10)
}
  0x1c   :  { %s446_s2 = scalar_lea.vmem %s23_s16, 32  ;;  %p451_p12 = scmp.lt.s32.totalorder %s23_s16, %s23_s16 }
  0x1d   :  { %p447_p11 = scmp.ne.s32.totalorder %s23_s16, %s446_s2  ;;  %p452_p13 = scmp.lt.s32.totalorder %s446_s2, %s446_s2 }
  0x1f   :  { %p453_p0 = por %p452_p13, %p451_p12 }
  0x21   :  { %p454_p1 = pnand %p453_p0, %p447_p11 }
  0x23   :  { %457 = shalt.err (!%p454_p1)
}
  0x24   :  { %25 = dma.hbm_to_vmem [thread:$0]  %s666_s0, 32, %s23_s16, [#allocation3]  }
  0x25   :  { %s458_s30 = scalar_lea.hbm %s669_s3, 256 }
  0x26   :  { %p459_p2 = scmp.ne.s32.totalorder %s669_s3, %s458_s30  ;;  %p462_p3 = scmp.lt.u32.totalorder %s458_s30, %s669_s3 }
  0x28   :  { %p464_p4 = pnand %p462_p3, %p459_p2 }
  0x2a   :  { %467 = shalt.err (!%p464_p4)
}
  0x2b   :  { %s468_s14 = scalar_lea.vmem %s46_s18, 256  ;;  %p473_p6 = scmp.lt.s32.totalorder %s46_s18, %s46_s18 }
  0x2c   :  { %p469_p5 = scmp.ne.s32.totalorder %s46_s18, %s468_s14  ;;  %p474_p7 = scmp.lt.s32.totalorder %s468_s14, %s468_s14 }
  0x2e   :  { %p475_p8 = por %p474_p7, %p473_p6 }
  0x30   :  { %p476_p9 = pnand %p475_p8, %p469_p5 }
  0x32   :  { %479 = shalt.err (!%p476_p9)
}
  0x33   :  { %51 = dma.hbm_to_vmem [thread:$0]  %s669_s3, 256, %s46_s18, [#allocation6], %s533_s11, %s533_s11, %s534_s12  }
  0x34   :  { %s537_s16 = smov [#allocation8]   ;;  %s480_s21 = scalar_lea.hbm %s670_s4, 16 }
  0x35   :  { %s58_s17 = sshll.u32 %s537_s16, 4  ;;  %p481_p10 = scmp.ne.s32.totalorder %s670_s4, %s480_s21  ;;  %s59_s17 = int_to_ptr.vmem [resolvable:$true] %s58_s17 }
  0x36   :  { %p484_p11 = scmp.lt.u32.totalorder %s480_s21, %s670_s4 }
  0x38   :  { %p486_p12 = pnand %p484_p11, %p481_p10 }
  0x3a   :  { %489 = shalt.err (!%p486_p12)
}
  0x3b   :  { %s490_s2 = scalar_lea.vmem %s59_s17, 16  ;;  %s494_s3 = scalar_lea.vmem %s59_s17, 32 }
  0x3c   :  { %p491_p13 = scmp.ne.s32.totalorder %s59_s17, %s490_s2  ;;  %p495_p0 = scmp.lt.s32.totalorder %s59_s17, %s59_s17 }
  0x3d   :  { %p496_p1 = scmp.lt.s32.totalorder %s494_s3, %s490_s2 }
  0x3f   :  { %p497_p2 = por %p496_p1, %p495_p0 }
  0x41   :  { %p498_p3 = pnand %p497_p2, %p491_p13 }
  0x43   :  { %501 = shalt.err (!%p498_p3)
}
  0x44   :  { %61 = dma.hbm_to_vmem [thread:$0]  %s670_s4, 16, %s59_s17, [#allocation9]  }
  0x45   :  { %524 = dma.done.wait [#allocation3], 32  }
  0x46   :  { %525 = vsyncadd [#allocation3], 4294967264 }
  0x47   :  { %526 = dma.done.wait [#allocation6], 512  }
  0x48   :  { %527 = vsyncadd [#allocation6], 4294966784 }
  0x49   :  { %528 = dma.done.wait [#allocation9], 16  }
  0x4a   :  { %529 = vsyncadd [#allocation9], 4294967280  ;;  %v538_v0 = vmov 0.0|0.0   ;;  %vm539_vm0 = vmmov 0   ;;  %v540_v1 = vmov 0.0   ;;  %vm88_vm1 = vcmask 1041408  }
  0x4b   :  { %391 = vmatprep.subr.bf16.mxu0 %v538_v0  ;;  %395 = vmatprep.subr.bf16.mxu1 %v538_v0  ;;  %vm541_vm2 = vmmov 1   ;;  %v82_v2 = vld [vmem:[#allocation7] sm:$0xff]  ;;  %v83_v3 = vld [vmem:[#allocation7 + $0x8] sm:$0x3]  ;;  %v79_v4 = vld [vmem:[#allocation5] sm:$0xff]  ;;  %vm84_vm4 = vcmask 80896  }
  0x4c   :  { %374 = vmatprep.mubr.msk.f32.mxu0 %vm539_vm0, %v540_v1  ;;  %381 = vmatprep.mubr.msk.f32.mxu1 %vm539_vm0, %v540_v1  ;;  %vm393_vm3 = vmpackc.low %vm88_vm1, %vm541_vm2  ;;  %v392_v5 = vpack.c.bf16 %v83_v3, %v82_v2  ;;  %v80_v6 = vld [vmem:[#allocation5 + $0x8] sm:$0x3]  ;;  %v81_v8 = vld [vmem:[%s667_s1] sm:$0x3]  ;;  %vm260_vm5 = vcmask 1046528   ;;  %vm256_vm7 = vcmask 121856  }
  0x4d   :  { %v396_v7 = vpack.c.bf16 %v80_v6, %v79_v4  ;;  %v78_v9 = vld [vmem:[#allocation2] sm:$0x3]  ;;  %vm401_vm6 = vmpackc.low %vm260_vm5, %vm541_vm2  ;;  %v247_v10 = vld [vmem:[%s671_s5] sm:$0xff]  ;;  %s542_s8 = smov [#allocation10]   ;;  %vm334_vm8 = vcmask 74752  }
  0x4e   :  { %394 = vmatpush3.bf16.msk.msra.mxu0 %vm393_vm3, %v392_v5  ;;  %v248_v11 = vld [vmem:[%s671_s5 + $0x8] sm:$0x7f]  ;;  %v357_v15 = vld [vmem:[#allocation8] ss:$0 sm:$0xff]  ;;  %v358_v21 = vld [vmem:[%s672_s6] ss:$0 sm:$0xff] }
  0x4f   :  { %398 = vmatpush3.bf16.msk.msra.mxu1 %vm393_vm3, %v396_v7  ;;  %399 = vmatprep.subr.bf16.mxu0 %v538_v0  ;;  %v400_v12 = vpack.c.bf16 %v248_v11, %v247_v10  ;;  %s342_s9 = sshll.u32 %s542_s8, 4  ;;  %s343_s9 = int_to_ptr.vmem [resolvable:$true] %s342_s9 }
  0x50   :  { %s502_s5 = scalar_lea.vmem %s343_s9, 32  ;;  %p507_p5 = scmp.lt.s32.totalorder %s343_s9, %s343_s9 }
  0x51   :  { %375 = vmatmul.mubr.msk.f32.vlgmr.msra.gmra.mrb[0].mxu0 %vm84_vm4, %v81_v8  ;;  %p503_p4 = scmp.ne.s32.totalorder %s343_s9, %s502_s5  ;;  %p508_p6 = scmp.lt.s32.totalorder %s502_s5, %s502_s5 }
  0x52   :  { %382 = vmatmul.mubr.msk.f32.vlgmr.msra.gmra.mrb[0].mxu1 %vm84_vm4, %v78_v9  ;;  %388 = vmatprep.mubr.msk.f32.mxu0 %vm539_vm0, %v540_v1 }
  0x53   :  { %402 = vmatpush3.bf16.msk.msra.mxu0 %vm401_vm6, %v400_v12  ;;  %p509_p7 = por %p508_p6, %p507_p5 }
  0x55   :  { %p510_p8 = pnand %p509_p7, %p503_p4 }
 0x124   :  { %v158_v13 = vpop.f32.mrb[0].mxu0 }
 0x125   :  { %v234_v14 = vpop.f32.mrb[0].mxu1  ;;  %v376_v16 = vpop.f32.mrb[1].mxu0 }
 0x126   :  { %v235_v17 = vadd.f32 %v234_v14, %v158_v13  ;;  %v383_v18 = vpop.f32.mrb[1].mxu1 }
 0x128   :  { %v245_v19 = vadd.f32 %v357_v15, %v235_v17 }
 0x12a   :  { %v246_v20 = vmax.f32 %v245_v19, 0.0 }
 0x12c   :  { %389 = vmatmul.mubr.msk.f32.vlgmr.msra.gmra.mrb[2].mxu0 %vm256_vm7, %v246_v20 }
 0x1ff   :  { %v330_v22 = vpop.f32.mrb[2].mxu0 }
 0x200   :  { %v331_v23 = vadd.f32 %v358_v21, %v330_v22  ;;  %v390_v24 = vpop.f32.mrb[3].mxu0 }
 0x202   :  { %335 = vst.msk [vmem:[#allocation10] sm:$0x3] %vm334_vm8, %v331_v23 }
 0x203   :  { %513 = shalt.err (!%p510_p8)
}
 0x204   :  { %s514_s14 = scalar_lea.hbm %s673_s7, 32 }
 0x205   :  { %p515_p9 = scmp.ne.s32.totalorder %s673_s7, %s514_s14  ;;  %p518_p10 = scmp.lt.u32.totalorder %s514_s14, %s673_s7 }
 0x207   :  { %p520_p11 = pnand %p518_p10, %p515_p9 }
 0x209   :  { %523 = shalt.err (!%p520_p11)
}
 0x20a   :  { %345 = dma.vmem_to_hbm [thread:$0]  %s343_s9, 32, %s673_s7, [#allocation4]  }
 0x20b   :  { %530 = dma.done.wait [#allocation4], 32  }
 0x20c   :  { %531 = vsyncadd [#allocation4], 4294967264 }
 0x20d   :  { %349 = vsyncpa [#allocation3], 1 }
 0x20e   :  { %350 = vsyncpa [#allocation6], 1 }
 0x20f   :  { %351 = vsyncpa [#allocation9], 1 }
 0x210   :  { %352 = vsyncpa [#allocation4], 1 }

</bundles_post_ra>
